<compile_context>
chip_gen: v6e
topology: v6e:2x2x1
jax: 0.10.0
libtpu: 0.0.40
codegen_flags: <defaults>
</compile_context>

<pallas_src>
import functools

import jax
import jax.numpy as jnp
from jax.experimental import pallas as pl
from jax.experimental.pallas import tpu as pltpu

_EPS = 1e-8  # F.cosine_similarity default eps


def _moon_loss_kernel(z_ref, zp_ref, zg_ref, out_ref, *,
                      inv_tau, n_total, tm, tiles_per_split, use_mxu):
    """One (tm, D) row-tile of the MOON loss, accumulated into out_ref[0, 0]."""
    s = pl.program_id(0)   # batch split (parallel; one per TensorCore on v7x)
    i = pl.program_id(1)   # tile within the split (reduction axis)

    @pl.when(i == 0)
    def _init():
        out_ref[0, 0] = jnp.float32(0.0)

    z = z_ref[...].astype(jnp.float32)
    zp = zp_ref[...].astype(jnp.float32)
    zg = zg_ref[...].astype(jnp.float32)

    d = z.shape[-1]
    eps2 = jnp.float32(_EPS * _EPS)

    if use_mxu:
        # Offload the five D-reductions to the (otherwise idle) MXU so the XLU
        # lane reduction is not the binding unit for small-D / sub-32-bit
        # inputs.  Every output lane carries the row sum, so the downstream
        # rsqrt/exp/log stay lane-dense (same vreg count as a (tm, 1) layout).
        ones = jnp.ones((d, 128), dtype=jnp.float32)

        def rowsum(x):
            return jnp.dot(x, ones, preferred_element_type=jnp.float32)
    else:
        def rowsum(x):
            return jnp.sum(x, axis=-1, keepdims=True)

    w_zz = rowsum(z * z)                                     # shared ||z||^2

    def cos_with_z(b):
        w12 = rowsum(z * b)
        wbb = rowsum(b * b)
        return w12 * jax.lax.rsqrt(jnp.maximum(w_zz * wbb, eps2))

    sim_prev = cos_with_z(zp) * inv_tau
    sim_glob = cos_with_z(zg) * inv_tau

    # Mask tail / surplus rows (rows >= N are pipeline padding, possibly garbage).
    row = jax.lax.broadcasted_iota(jnp.int32, sim_prev.shape, 0)
    global_row = (s * tiles_per_split + i) * tm + row
    valid = global_row < n_total

    delta = jnp.where(valid, sim_prev - sim_glob, jnp.float32(0.0))
    # -log(exp(sg)/(exp(sg)+exp(sp))) == softplus(sp - sg); stable form avoids
    # overflow for large positive delta (small tau, anti-correlated features).
    loss = jnp.maximum(delta, 0.0) + jnp.log1p(jnp.exp(-jnp.abs(delta)))
    loss = jnp.where(valid, loss, jnp.float32(0.0))

    # Fold the tile to a scalar and accumulate straight into the SMEM partial
    # (no lane-padded VMEM accumulator, no masked 1-lane stores).
    out_ref[0, 0] += jnp.sum(loss[:, :1])


def _cdiv(a, b):
    return -(-a // b)


def _round_up(x, m):
    return _cdiv(x, m) * m


def _vmem_params():
    """(vmem_limit_bytes, pipeline-buffer budget) derived from the chip's VMEM."""
    cap = 64 * 1024 * 1024            # conservative fallback: v7x per-TC VMEM
    try:
        info = pltpu.get_tpu_info()
        cap = int(getattr(info, "vmem_capacity_bytes", cap)) or cap
    except Exception:
        pass
    limit = (3 * cap) // 4            # ~48 MiB on v7x, ~96 MiB on v5e/v6e
    budget = (3 * limit) // 5         # ~60% of the scoped limit for buffers
    return limit, budget


def _default_num_splits():
    """Core count on multi-TensorCore chips (v7x), else 1 (no wasted steps)."""
    try:
        info = pltpu.get_tpu_info()
        for attr in ("num_cores", "core_count", "tensorcore_count", "num_tensorcores"):
            v = getattr(info, attr, None)
            if v:
                return max(1, int(v))
    except Exception:
        pass
    return 1


def _pick_tm(n, d, itemsize, budget):
    """Largest row tile whose pipeline buffers + f32 temporaries fit `budget`."""
    sub = {4: 8, 2: 16, 1: 32}.get(itemsize, 8)      # sublane packing per dtype
    # 3 inputs x 2 pipeline buffers + ~4 live (tm, D) f32 temporaries
    # (upcasts / elementwise products) materialized inside the kernel.
    per_row = 6 * d * itemsize + 4 * d * 4
    tm_cap = max(sub, budget // per_row)
    tm = min(8192, tm_cap, _round_up(n, sub))
    tm = max(sub, (tm // sub) * sub)
    return tm


def moon_contrastive_loss(z, z_prev, z_glob, tau: float = 1.0,
                          tm: int | None = None,
                          num_splits: int | None = None,
                          use_mxu_reduce: bool | None = None):
    """MOON contrastive loss; returns a scalar float32."""
    if tau <= 0.0:
        raise ValueError("tau must be positive")
    assert z.shape == z_prev.shape == z_glob.shape
    assert z.dtype == z_prev.dtype == z_glob.dtype
    n, d = z.shape

    itemsize = jnp.dtype(z.dtype).itemsize
    sub = {4: 8, 2: 16, 1: 32}.get(itemsize, 8)
    vmem_limit, budget = _vmem_params()

    if use_mxu_reduce is None:
        # MXU reduction pays off when the XLU lane reductions bind (sub-32-bit
        # inputs); f32 inputs stay on the plain lane reduce (HBM-bound there).
        # TODO(synk): also enable for f32/small-D once verified on a bundle dump.
        use_mxu_reduce = (itemsize < 4) and (d % 128 == 0)
    if use_mxu_reduce:
        budget = max(budget - d * 512, 1)    # room for the (D, 128) ones matrix

    if tm is None:
        tm = _pick_tm(n, d, itemsize, budget)
    assert tm >= 1 and (tm % sub == 0 or tm == n), "tm must match sublane packing"

    total_tiles = _cdiv(n, tm)
    if num_splits is None:
        num_splits = min(_default_num_splits(), total_tiles)
        # Prefer a split count that divides total_tiles (no masked surplus steps).
        while num_splits > 1 and total_tiles % num_splits != 0:
            num_splits -= 1
    num_splits = max(1, min(int(num_splits), total_tiles))
    tiles_per_split = _cdiv(total_tiles, num_splits)

    kernel = functools.partial(
        _moon_loss_kernel,
        inv_tau=float(1.0 / tau),
        n_total=n,
        tm=tm,
        tiles_per_split=tiles_per_split,
        use_mxu=use_mxu_reduce,
    )

    def row_index_map(s, i):
        # The last split may have fewer real tiles; surplus iterations re-load
        # a valid tile and are fully masked inside the kernel.
        return (jnp.minimum(s * tiles_per_split + i, total_tiles - 1), 0)

    row_spec = pl.BlockSpec((tm, d), row_index_map)

    cost = pl.CostEstimate(
        flops=int(n * (10 * d + 24)),
        transcendentals=int(4 * n),
        bytes_accessed=int(3 * n * d * itemsize + 4 * num_splits),
    )

    partials = pl.pallas_call(
        kernel,
        out_shape=jax.ShapeDtypeStruct((num_splits, 1), jnp.float32),
        grid_spec=pltpu.PrefetchScalarGridSpec(
            num_scalar_prefetch=0,
            grid=(num_splits, tiles_per_split),
            in_specs=[row_spec, row_spec, row_spec],
            out_specs=pl.BlockSpec((1, 1), lambda s, i: (s, 0),
                                   memory_space=pltpu.SMEM),
        ),
        compiler_params=pltpu.CompilerParams(
            dimension_semantics=("parallel", "arbitrary"),
            vmem_limit_bytes=int(vmem_limit),
        ),
        cost_estimate=cost,
    )(z, z_prev, z_glob)

    return jnp.sum(partials) / jnp.float32(n)


def _reference(z, z_prev, z_glob, tau):
    # pure-JAX reference mirroring the PyTorch module (computed in f32)
    z = z.astype(jnp.float32)
    z_prev = z_prev.astype(jnp.float32)
    z_glob = z_glob.astype(jnp.float32)

    def cos(a, b):
        w12 = jnp.sum(a * b, axis=1)
        w1 = jnp.sum(a * a, axis=1)
        w2 = jnp.sum(b * b, axis=1)
        return w12 / jnp.sqrt(jnp.maximum(w1 * w2, _EPS * _EPS))

    ep = jnp.exp(cos(z, z_prev) / tau)
    eg = jnp.exp(cos(z, z_glob) / tau)
    return jnp.mean(-jnp.log(eg / (eg + ep)))


if __name__ == "__main__":
    key = jax.random.PRNGKey(0)
    k1, k2, k3 = jax.random.split(key, 3)
    tau = 0.5

    # 1) small f32 case, default (auto) tiling / splits — lane-reduce path.
    N, D = 16, 128
    z = jax.random.normal(k1, (N, D), dtype=jnp.float32)
    z_prev = jax.random.normal(k2, (N, D), dtype=jnp.float32)
    z_glob = jax.random.normal(k3, (N, D), dtype=jnp.float32)
    loss = jax.block_until_ready(moon_contrastive_loss(z, z_prev, z_glob, tau=tau))
    ref = _reference(z, z_prev, z_glob, tau)
    assert jnp.allclose(loss, ref, rtol=1e-5, atol=1e-6), (loss, ref)

    # 2) ragged batch + multi-tile + forced two-split path (exercises tail
    #    masking and the fully-masked surplus iteration of the last split).
    N2 = 20
    z2 = jax.random.normal(k1, (N2, D), dtype=jnp.float32)
    zp2 = jax.random.normal(k2, (N2, D), dtype=jnp.float32)
    zg2 = jax.random.normal(k3, (N2, D), dtype=jnp.float32)
    loss2 = jax.block_until_ready(
        moon_contrastive_loss(z2, zp2, zg2, tau=tau, tm=8, num_splits=2,
                              use_mxu_reduce=False))
    ref2 = _reference(z2, zp2, zg2, tau)
    assert jnp.allclose(loss2, ref2, rtol=1e-5, atol=1e-6), (loss2, ref2)

    # 3) bf16 inputs — exercises the MXU row-reduction path (looser tolerance:
    #    MXU f32 dot precision may be reduced, inputs are bf16 anyway).
    N3, D3 = 24, 256
    z3 = jax.random.normal(k1, (N3, D3), dtype=jnp.float32).astype(jnp.bfloat16)
    zp3 = jax.random.normal(k2, (N3, D3), dtype=jnp.float32).astype(jnp.bfloat16)
    zg3 = jax.random.normal(k3, (N3, D3), dtype=jnp.float32).astype(jnp.bfloat16)
    loss3 = jax.block_until_ready(moon_contrastive_loss(z3, zp3, zg3, tau=tau))
    ref3 = _reference(z3, zp3, zg3, tau)
    assert jnp.allclose(loss3, ref3, rtol=2e-2, atol=2e-2), (loss3, ref3)

    print("KERNEL_OK")
</pallas_src>

<mosaic_0001>
module attributes {stable_mosaic.version = 11 : i64} {
  func.func @_moon_loss_kernel(%arg0: i32, %arg1: i32, %arg2: memref<16x128xf32, #tpu.memory_space<vmem>>, %arg3: memref<16x128xf32, #tpu.memory_space<vmem>>, %arg4: memref<16x128xf32, #tpu.memory_space<vmem>>, %arg5: memref<1x1xf32, #tpu.memory_space<smem>>) attributes {dimension_semantics = [#tpu.dimension_semantics<parallel>, #tpu.dimension_semantics<arbitrary>], iteration_bounds = array<i64: 1, 1>, scalar_prefetch = 0 : i64, scratch_operands = 0 : i64, tpu.core_type = #tpu.core_type<tc>, window_params = [{transform_indices = @transform_0, window_bounds = array<i64: 16, 128>}, {transform_indices = @transform_1, window_bounds = array<i64: 16, 128>}, {transform_indices = @transform_2, window_bounds = array<i64: 16, 128>}, {transform_indices = @transform_3, window_bounds = array<i64: 1, 1>}]} {
    %c0_i32 = arith.constant 0 : i32
    %0 = arith.cmpi eq, %arg1, %c0_i32 : i32
    %1 = arith.extui %0 : i1 to i32
    %c0_i32_0 = arith.constant 0 : i32
    %2 = arith.cmpi ne, %1, %c0_i32_0 : i32
    scf.if %2 {
      %cst_24 = arith.constant 0.000000e+00 : f32
      %c0_25 = arith.constant 0 : index
      %c0_26 = arith.constant 0 : index
      %63 = memref.load %arg5[%c0_25, %c0_26] : memref<1x1xf32, #tpu.memory_space<smem>>
      memref.store %cst_24, %arg5[%c0_25, %c0_26] : memref<1x1xf32, #tpu.memory_space<smem>>
    } else {
    }
    %c0 = arith.constant 0 : index
    %c0_1 = arith.constant 0 : index
    %3 = vector.load %arg2[%c0, %c0_1] : memref<16x128xf32, #tpu.memory_space<vmem>>, vector<16x128xf32>
    %c0_2 = arith.constant 0 : index
    %c0_3 = arith.constant 0 : index
    %4 = vector.load %arg3[%c0_2, %c0_3] : memref<16x128xf32, #tpu.memory_space<vmem>>, vector<16x128xf32>
    %c0_4 = arith.constant 0 : index
    %c0_5 = arith.constant 0 : index
    %5 = vector.load %arg4[%c0_4, %c0_5] : memref<16x128xf32, #tpu.memory_space<vmem>>, vector<16x128xf32>
    %6 = arith.mulf %3, %3 : vector<16x128xf32>
    %cst = arith.constant dense<0.000000e+00> : vector<16xf32>
    %7 = vector.multi_reduction <add>, %6, %cst [1] : vector<16x128xf32> to vector<16xf32>
    %8 = vector.shape_cast %7 : vector<16xf32> to vector<16x1xf32>
    %9 = arith.mulf %3, %4 : vector<16x128xf32>
    %cst_6 = arith.constant dense<0.000000e+00> : vector<16xf32>
    %10 = vector.multi_reduction <add>, %9, %cst_6 [1] : vector<16x128xf32> to vector<16xf32>
    %11 = vector.shape_cast %10 : vector<16xf32> to vector<16x1xf32>
    %12 = arith.mulf %4, %4 : vector<16x128xf32>
    %cst_7 = arith.constant dense<0.000000e+00> : vector<16xf32>
    %13 = vector.multi_reduction <add>, %12, %cst_7 [1] : vector<16x128xf32> to vector<16xf32>
    %14 = vector.shape_cast %13 : vector<16xf32> to vector<16x1xf32>
    %15 = arith.mulf %8, %14 : vector<16x1xf32>
    %cst_8 = arith.constant 1.000000e-16 : f32
    %16 = vector.broadcast %cst_8 : f32 to vector<16x1xf32>
    %17 = arith.maximumf %15, %16 : vector<16x1xf32>
    %18 = math.rsqrt %17 : vector<16x1xf32>
    %19 = arith.mulf %11, %18 : vector<16x1xf32>
    %cst_9 = arith.constant 2.000000e+00 : f32
    %20 = vector.broadcast %cst_9 : f32 to vector<16x1xf32>
    %21 = arith.mulf %19, %20 : vector<16x1xf32>
    %22 = arith.mulf %3, %5 : vector<16x128xf32>
    %cst_10 = arith.constant dense<0.000000e+00> : vector<16xf32>
    %23 = vector.multi_reduction <add>, %22, %cst_10 [1] : vector<16x128xf32> to vector<16xf32>
    %24 = vector.shape_cast %23 : vector<16xf32> to vector<16x1xf32>
    %25 = arith.mulf %5, %5 : vector<16x128xf32>
    %cst_11 = arith.constant dense<0.000000e+00> : vector<16xf32>
    %26 = vector.multi_reduction <add>, %25, %cst_11 [1] : vector<16x128xf32> to vector<16xf32>
    %27 = vector.shape_cast %26 : vector<16xf32> to vector<16x1xf32>
    %28 = arith.mulf %8, %27 : vector<16x1xf32>
    %cst_12 = arith.constant 1.000000e-16 : f32
    %29 = vector.broadcast %cst_12 : f32 to vector<16x1xf32>
    %30 = arith.maximumf %28, %29 : vector<16x1xf32>
    %31 = math.rsqrt %30 : vector<16x1xf32>
    %32 = arith.mulf %24, %31 : vector<16x1xf32>
    %cst_13 = arith.constant 2.000000e+00 : f32
    %33 = vector.broadcast %cst_13 : f32 to vector<16x1xf32>
    %34 = arith.mulf %32, %33 : vector<16x1xf32>
    %35 = tpu.iota {dimensions = array<i32: 0>} : vector<16x1xi32>
    %c1_i32 = arith.constant 1 : i32
    %36 = arith.muli %arg0, %c1_i32 : i32
    %37 = arith.addi %36, %arg1 : i32
    %c16_i32 = arith.constant 16 : i32
    %38 = arith.muli %37, %c16_i32 : i32
    %39 = vector.broadcast %38 : i32 to vector<16x1xi32>
    %40 = arith.addi %39, %35 : vector<16x1xi32>
    %c16_i32_14 = arith.constant 16 : i32
    %41 = vector.broadcast %c16_i32_14 : i32 to vector<16x1xi32>
    %42 = arith.cmpi slt, %40, %41 : vector<16x1xi32>
    %43 = arith.subf %21, %34 : vector<16x1xf32>
    %cst_15 = arith.constant 0.000000e+00 : f32
    %44 = vector.broadcast %cst_15 : f32 to vector<16x1xf32>
    %45 = arith.select %42, %43, %44 : vector<16x1xi1>, vector<16x1xf32>
    %cst_16 = arith.constant 0.000000e+00 : f32
    %46 = vector.broadcast %cst_16 : f32 to vector<16x1xf32>
    %47 = arith.maximumf %45, %46 : vector<16x1xf32>
    %48 = math.absf %45 : vector<16x1xf32>
    %cst_17 = arith.constant 0.000000e+00 : f32
    %49 = vector.broadcast %cst_17 : f32 to vector<16x1xf32>
    %50 = arith.subf %49, %48 : vector<16x1xf32>
    %51 = math.exp %50 : vector<16x1xf32>
    %52 = math.log1p %51 : vector<16x1xf32>
    %53 = arith.addf %47, %52 : vector<16x1xf32>
    %cst_18 = arith.constant 0.000000e+00 : f32
    %54 = vector.broadcast %cst_18 : f32 to vector<16x1xf32>
    %55 = arith.select %42, %53, %54 : vector<16x1xi1>, vector<16x1xf32>
    %c0_19 = arith.constant 0 : index
    %c0_20 = arith.constant 0 : index
    %56 = memref.load %arg5[%c0_19, %c0_20] : memref<1x1xf32, #tpu.memory_space<smem>>
    %57 = vector.shape_cast %55 : vector<16x1xf32> to vector<1x16x1xf32>
    %cst_21 = arith.constant dense<0.000000e+00> : vector<1xf32>
    %58 = vector.multi_reduction <add>, %57, %cst_21 [1, 2] : vector<1x16x1xf32> to vector<1xf32>
    %59 = vector.shape_cast %58 : vector<1xf32> to vector<1x1x1xf32>
    %60 = vector.extract %59[0, 0, 0] : f32 from vector<1x1x1xf32>
    %61 = arith.addf %56, %60 : f32
    %c0_22 = arith.constant 0 : index
    %c0_23 = arith.constant 0 : index
    %62 = memref.load %arg5[%c0_22, %c0_23] : memref<1x1xf32, #tpu.memory_space<smem>>
    memref.store %61, %arg5[%c0_22, %c0_23] : memref<1x1xf32, #tpu.memory_space<smem>>
    return
  }
  func.func @transform_0(%arg0: i32, %arg1: i32) -> (i32, i32) {
    %c1_i32 = arith.constant 1 : i32
    %0 = arith.muli %arg0, %c1_i32 : i32
    %1 = arith.addi %0, %arg1 : i32
    %c0_i32 = arith.constant 0 : i32
    %2 = arith.minsi %1, %c0_i32 : i32
    %c0_i32_0 = arith.constant 0 : i32
    %c0_i32_1 = arith.constant 0 : i32
    return %2, %c0_i32_0 : i32, i32
  }
  func.func @transform_1(%arg0: i32, %arg1: i32) -> (i32, i32) {
    %c1_i32 = arith.constant 1 : i32
    %0 = arith.muli %arg0, %c1_i32 : i32
    %1 = arith.addi %0, %arg1 : i32
    %c0_i32 = arith.constant 0 : i32
    %2 = arith.minsi %1, %c0_i32 : i32
    %c0_i32_0 = arith.constant 0 : i32
    %c0_i32_1 = arith.constant 0 : i32
    return %2, %c0_i32_0 : i32, i32
  }
  func.func @transform_2(%arg0: i32, %arg1: i32) -> (i32, i32) {
    %c1_i32 = arith.constant 1 : i32
    %0 = arith.muli %arg0, %c1_i32 : i32
    %1 = arith.addi %0, %arg1 : i32
    %c0_i32 = arith.constant 0 : i32
    %2 = arith.minsi %1, %c0_i32 : i32
    %c0_i32_0 = arith.constant 0 : i32
    %c0_i32_1 = arith.constant 0 : i32
    return %2, %c0_i32_0 : i32, i32
  }
  func.func @transform_3(%arg0: i32, %arg1: i32) -> (i32, i32) {
    %c0_i32 = arith.constant 0 : i32
    %c0_i32_0 = arith.constant 0 : i32
    return %arg0, %c0_i32 : i32, i32
  }
}

</mosaic_0001>

<bundles_post_ra>
// kernel: tpu_custom_call.1
= control target key start
LH: loop header
LB: loop body
LE: loop exit
PB: predicated region body
PF: predicated region fallthrough
CT: control target
= control target key end

     0   :  { %8 = vsyncpa [#allocation3], 0  ;;  %s369_s0 = inlined_call_operand.hbm [shape: f32[16,128], index: 0, kind: input, shape index: {}]   ;;  %s370_s1 = inlined_call_operand.hbm [shape: f32[16,128], index: 1, kind: input, shape index: {}]   ;;  %s371_s2 = inlined_call_operand.hbm [shape: f32[16,128], index: 2, kind: input, shape index: {}]   ;;  %s372_s3 = inlined_call_operand.hbm [shape: f32[1,1], index: 3, kind: output, shape index: {}]  }
   0x1   :  { %9 = vsyncpa [#allocation6], 0 }
   0x2   :  { %10 = vsyncpa [#allocation4], 0  ;;  %s331_s12 = smov [#allocation5]   ;;  %s332_s14 = smov [#allocation2]  }
   0x3   :  { %s40_s13 = sshll.u32 %s331_s12, 4  ;;  %s22_s15 = sshll.u32 %s332_s14, 4  ;;  %s41_s13 = int_to_ptr.vmem [resolvable:$true] %s40_s13  ;;  %s23_s15 = int_to_ptr.vmem [resolvable:$true] %s22_s15 }
   0x4   :  { %s265_s16 = scalar_lea.vmem %s41_s13, 256  ;;  %p270_p1 = scmp.lt.s32.totalorder %s41_s13, %s41_s13 }
   0x5   :  { %p266_p0 = scmp.ne.s32.totalorder %s41_s13, %s265_s16  ;;  %p271_p2 = scmp.lt.s32.totalorder %s265_s16, %s265_s16 }
   0x7   :  { %p272_p3 = por %p271_p2, %p270_p1 }
   0x9   :  { %p273_p4 = pnand %p272_p3, %p266_p0 }
   0xb   :  { %276 = shalt.err (!%p273_p4)
}
   0xc   :  { %s333_s17 = smov 128   ;;  %s334_s18 = smov 8  }
   0xd   :  { %46 = dma.hbm_to_vmem [thread:$0]  %s370_s1, 256, %s41_s13, [#allocation6], %s333_s17, %s333_s17, %s334_s18  }
   0xe   :  { %s285_s21 = scalar_lea.vmem %s23_s15, 256  ;;  %p290_p6 = scmp.lt.s32.totalorder %s23_s15, %s23_s15 }
   0xf   :  { %p286_p5 = scmp.ne.s32.totalorder %s23_s15, %s285_s21  ;;  %p291_p7 = scmp.lt.s32.totalorder %s285_s21, %s285_s21 }
  0x11   :  { %p292_p8 = por %p291_p7, %p290_p6 }
  0x13   :  { %p293_p9 = pnand %p292_p8, %p286_p5 }
  0x15   :  { %296 = shalt.err (!%p293_p9)
}
  0x16   :  { %28 = dma.hbm_to_vmem [thread:$0]  %s369_s0, 256, %s23_s15, [#allocation3], %s333_s17, %s333_s17, %s334_s18  }
  0x17   :  { %s335_s24 = smov [#allocation7]  }
  0x18   :  { %s58_s25 = sshll.u32 %s335_s24, 4  ;;  %s59_s25 = int_to_ptr.vmem [resolvable:$true] %s58_s25 }
  0x19   :  { %s305_s26 = scalar_lea.vmem %s59_s25, 256  ;;  %p310_p11 = scmp.lt.s32.totalorder %s59_s25, %s59_s25 }
  0x1a   :  { %p306_p10 = scmp.ne.s32.totalorder %s59_s25, %s305_s26  ;;  %p311_p12 = scmp.lt.s32.totalorder %s305_s26, %s305_s26 }
  0x1c   :  { %p312_p13 = por %p311_p12, %p310_p11 }
  0x1e   :  { %p313_p0 = pnand %p312_p13, %p306_p10 }
  0x20   :  { %316 = shalt.err (!%p313_p0)
}
  0x21   :  { %64 = dma.hbm_to_vmem [thread:$0]  %s371_s2, 256, %s59_s25, [#allocation6], %s333_s17, %s333_s17, %s334_s18  }
  0x22   :  { %325 = dma.done.wait [#allocation3], 256  }
  0x23   :  { %326 = vsyncadd [#allocation3], 4294967040 }
  0x24   :  { %327 = dma.done.wait [#allocation6], 512  }
  0x25   :  { %328 = vsyncadd [#allocation6], 4294966784  ;;  %v94_v0 = vld [vmem:[#allocation5] sm:$0xff]  ;;  %v92_v1 = vld [vmem:[#allocation2] sm:$0xff]  ;;  %vm195_vm2 = vcmask 7168   ;;  %s336_s2 = smov [#allocation8]  }
  0x26   :  { %v95_v2 = vld [vmem:[#allocation5 + $0x8] sm:$0xff]  ;;  %v110_v3 = vmul.f32 %v94_v0, %v94_v0  ;;  %v98_v4 = vmul.f32 %v92_v1, %v92_v1  ;;  %v93_v5 = vld [vmem:[#allocation2 + $0x8] sm:$0xff]  ;;  %v96_v9 = vld [vmem:[#allocation7] sm:$0xff]  ;;  %v104_v12 = vmul.f32 %v94_v0, %v92_v1 }
  0x27   :  { %v111_v6 = vmul.f32 %v95_v2, %v95_v2  ;;  %v99_v7 = vmul.f32 %v93_v5, %v93_v5  ;;  %v97_v8 = vld [vmem:[#allocation7 + $0x8] sm:$0xff]  ;;  %v132_v11 = vmul.f32 %v96_v9, %v96_v9  ;;  %v105_v13 = vmul.f32 %v95_v2, %v93_v5 }
  0x28   :  { %112 = vadd.xlane.f32.xlu1 %v110_v3  ;;  %100 = vadd.xlane.f32.xlu0 %v98_v4  ;;  %v133_v10 = vmul.f32 %v97_v8, %v97_v8  ;;  %v127_v14 = vmul.f32 %v97_v8, %v93_v5  ;;  %v126_v15 = vmul.f32 %v96_v9, %v92_v1 }
  0x2c   :  { %114 = vadd.xlane.f32.xlu1 %v111_v6  ;;  %102 = vadd.xlane.f32.xlu0 %v99_v7 }
  0x30   :  { %136 = vadd.xlane.f32.xlu1 %v133_v10  ;;  %134 = vadd.xlane.f32.xlu0 %v132_v11 }
  0x34   :  { %106 = vadd.xlane.f32.xlu0 %v104_v12  ;;  %108 = vadd.xlane.f32.xlu1 %v105_v13 }
  0x38   :  { %130 = vadd.xlane.f32.xlu1 %v127_v14  ;;  %128 = vadd.xlane.f32.xlu0 %v126_v15 }
  0xb1   :  { %v113_v16 = vpop.xlane.xlu1 %112  ;;  %v101_v17 = vpop.xlane.xlu0 %100 }
  0xb2   :  { %v116_v18 = vmul.f32 %v113_v16, %v101_v17 }
  0xb4   :  { %v118_v22 = vmax.f32 %v116_v18, 1e-16 }
  0xb5   :  { %v115_v19 = vpop.xlane.xlu1 %114  ;;  %v103_v20 = vpop.xlane.xlu0 %102 }
  0xb6   :  { %v117_v21 = vmul.f32 %v115_v19, %v103_v20 }
  0xb8   :  { %v119_v23 = vmax.f32 %v117_v21, 1e-16 }
  0xb9   :  { %v137_v24 = vpop.xlane.xlu1 %136  ;;  %v135_v25 = vpop.xlane.xlu0 %134 }
  0xba   :  { %241 = vrsqrt.f32 %v119_v23  ;;  %v139_v26 = vmul.f32 %v137_v24, %v103_v20  ;;  %v138_v27 = vmul.f32 %v135_v25, %v101_v17 }
  0xbb   :  { %243 = vrsqrt.f32 %v118_v22 }
  0xbc   :  { %v141_v28 = vmax.f32 %v139_v26, 1e-16  ;;  %v140_v29 = vmax.f32 %v138_v27, 1e-16 }
  0xbd   :  { %v109_v30 = vpop.xlane.xlu1 %108  ;;  %v107_v31 = vpop.xlane.xlu0 %106 }
  0xbe   :  { %245 = vrsqrt.f32 %v141_v28 }
  0xbf   :  { %247 = vrsqrt.f32 %v140_v29 }
  0xc1   :  { %v131_v34 = vpop.xlane.xlu1 %130  ;;  %v129_v36 = vpop.xlane.xlu0 %128 }
  0xc7   :  { %v242_v32 = vpop.eup %241 }
  0xc8   :  { %v244_v33 = vpop.eup %243  ;;  %v123_v35 = vmul.f32 %v242_v32, %v109_v30 }
  0xc9   :  { %v122_v38 = vmul.f32 %v244_v33, %v107_v31 }
  0xca   :  { %v125_v42 = vmul.f32 2.0, %v123_v35 }
  0xcb   :  { %v246_v37 = vpop.eup %245  ;;  %v124_v44 = vmul.f32 2.0, %v122_v38 }
  0xcc   :  { %v248_v39 = vpop.eup %247  ;;  %v145_v40 = vmul.f32 %v246_v37, %v131_v34 }
  0xcd   :  { %v144_v41 = vmul.f32 %v248_v39, %v129_v36 }
  0xce   :  { %v147_v43 = vmul.f32 2.0, %v145_v40 }
  0xcf   :  { %v146_v45 = vmul.f32 2.0, %v144_v41 }
  0xd0   :  { %v159_v46 = vsub.f32 %v125_v42, %v147_v43 }
  0xd1   :  { %v158_v47 = vsub.f32 %v124_v44, %v146_v45 }
  0xd2   :  { %v165_v48 = vand.u32 2147483647, %v159_v46  ;;  %v163_v4 = vmax.f32 %v159_v46, 0.0 }
  0xd3   :  { %v164_v49 = vand.u32 2147483647, %v158_v47  ;;  %v162_v7 = vmax.f32 %v158_v47, 0.0 }
  0xd4   :  { %v167_v50 = vsub.f32 0.0, %v165_v48 }
  0xd5   :  { %v166_v51 = vsub.f32 0.0, %v164_v49 }
  0xd6   :  { %v170_v52 = vmul.f32 1.442695, %v167_v50 }
  0xd7   :  { %v168_v53 = vmul.f32 1.442695, %v166_v51 }
  0xd8   :  { %249 = vpow2.f32 %v170_v52 }
  0xd9   :  { %251 = vpow2.f32 %v168_v53 }
  0xe5   :  { %v250_v54 = vpop.eup %249 }
  0xe6   :  { %v252_v55 = vpop.eup %251  ;;  %v181_v56 = vadd.f32 1.0, %v250_v54  ;;  %v184_v58 = vmul.f32 -0.5, %v250_v54  ;;  %v187_v62 = vand.u32 2147483647, %v250_v54 }
  0xe7   :  { %v172_v57 = vadd.f32 1.0, %v252_v55  ;;  %v175_v59 = vmul.f32 -0.5, %v252_v55  ;;  %v178_v63 = vand.u32 2147483647, %v252_v55 }
  0xe8   :  { %253 = vlog2.f32 %v181_v56  ;;  %v185_v60 = vadd.f32 1.0, %v184_v58  ;;  %vm188_vm0 = vcmp.lt.f32.partialorder %v187_v62, 0.0004427343 }
  0xe9   :  { %255 = vlog2.f32 %v172_v57  ;;  %v176_v61 = vadd.f32 1.0, %v175_v59  ;;  %vm179_vm1 = vcmp.lt.f32.partialorder %v178_v63, 0.0004427343 }
  0xea   :  { %v186_v3 = vmul.f32 %v250_v54, %v185_v60 }
  0xeb   :  { %v177_v6 = vmul.f32 %v252_v55, %v176_v61 }
  0xf5   :  { %v254_v0 = vpop.eup %253 }
  0xf6   :  { %v256_v1 = vpop.eup %255  ;;  %v183_v2 = vmul.f32 0.6931472, %v254_v0 }
  0xf7   :  { %v174_v5 = vmul.f32 0.6931472, %v256_v1 }
  0xf8   :  { %v189_v8 = vsel %vm188_vm0, %v186_v3, %v183_v2 }
  0xf9   :  { %v180_v9 = vsel %vm179_vm1, %v177_v6, %v174_v5  ;;  %v191_v10 = vadd.f32 %v189_v8, %v163_v4 }
  0xfa   :  { %v190_v11 = vadd.f32 %v180_v9, %v162_v7 }
  0xfb   :  { %v197_v12 = vsel %vm195_vm2, %v191_v10, 0.0 }
  0xfc   :  { %v196_v13 = vsel %vm195_vm2, %v190_v11, 0.0 }
  0xfd   :  { %v198_v14 = vadd.f32 %v197_v12, %v196_v13 }
  0xff   :  { %199 = vadd.xlane.f32.xlu0 %v198_v14 }
 0x188   :  { %v200_v15 = vpop.xlane.xlu0 %199 }
 0x189   :  { %v201_v16 = vrot.slane %v200_v15, 4 }
 0x18b   :  { %v202_v17 = vadd.f32 %v201_v16, %v200_v15 }
 0x18d   :  { %v203_v18 = vrot.slane %v202_v17, 2 }
 0x18f   :  { %v204_v19 = vadd.f32 %v203_v18, %v202_v17 }
 0x191   :  { %v205_v20 = vrot.slane %v204_v19, 1 }
 0x193   :  { %v206_v21 = vadd.f32 %v205_v20, %v204_v19 }
 0x195   :  { %232 = vpush %v206_v21 }
 0x1c6   :  { %s233_s0 = spop %232 }
 0x1c7   :  { %210 = sst [smem:[#allocation8]] %s233_s0 }
 0x1c8   :  { %218 = dma.smem_to_hbm %s336_s2, 16, %s372_s3, [#allocation4]  }
 0x1c9   :  { %329 = dma.done.wait [#allocation4], 16  }
 0x1ca   :  { %330 = vsyncadd [#allocation4], 4294967280 }
 0x1cb   :  { %222 = sfence }
 0x1cc   :  { %223 = vsyncpa [#allocation3], 1 }
 0x1cd   :  { %224 = vsyncpa [#allocation6], 1 }
 0x1ce   :  { %225 = vsyncpa [#allocation4], 1 }

</bundles_post_ra>
